<compile_context>
chip_gen: v7x
topology: tpu7x:2x2x1
jax: 0.10.0
libtpu: 0.0.40
codegen_flags: <defaults>
</compile_context>

<pallas_src>
import functools

import jax
import jax.numpy as jnp
from jax import lax
from jax.experimental import pallas as pl
from jax.experimental.pallas import tpu as pltpu


# ----------------------------------------------------------------------------- helpers


def _vmem_capacity_bytes():
    """Best-effort physical VMEM capacity query with a conservative fallback."""
    try:
        info = pltpu.get_tpu_info()
        for attr in ("vmem_capacity_bytes", "vmem_bytes", "vmem_size_bytes"):
            v = getattr(info, attr, None)
            if v:
                return int(v)
    except Exception:
        pass
    return 64 * 1024 * 1024  # v7x-sized fallback (safe lower bound for v5e/v6e too)


def _pick_c_tile(C, bytes_per_row, cap_bytes, align):
    """Channel tile: full C, or a sublane-aligned tile (divisor preferred, else cdiv)."""
    max_rows = max(1, cap_bytes // max(1, bytes_per_row))
    if C <= max_rows:
        return C                                   # full extent — always legal
    best = 0
    d = align
    while d <= max_rows:                           # largest aligned divisor of C
        if C % d == 0:
            best = d
        d += align
    if best:
        return best
    ct = (max_rows // 8) * 8                       # aligned cdiv tiling (masked last block)
    return max(ct, min(C, 8))


def _pick_n_tile(N, per_image_bytes, cap_bytes):
    """Fold batch images per block, keeping >=2 programs on the parallel axis."""
    if N <= 1:
        return 1
    max_nb = max(1, cap_bytes // max(1, per_image_bytes))
    max_nb = min(max_nb, max(1, N // 2))           # keep megacore / v7x dual-TC busy
    best = 1
    for d in range(1, min(max_nb, N) + 1):
        if N % d == 0:
            best = d
    return best


# ----------------------------------------------------------------------------- kernels


def _conv3x3_sigmoid(w_ref, avg, mx, *, W, HW, HWp):
    """sigmoid(3x3 zero-padded conv over [avg, mx]) in flat (..., HW) space -> (..., HWp)."""
    nd = avg.ndim
    if HWp != HW:
        tail_pad = [(0, 0)] * (nd - 1) + [(0, HWp - HW)]
        avg = jnp.pad(avg, tail_pad)
        mx = jnp.pad(mx, tail_pad)

    # For a shift (dy, dx): flat offset = dy*W + dx. Row under/overflow lands in the
    # zero pad; column wrap across row boundaries is masked via the column index.
    P = W + 1
    padP = [(0, 0)] * (nd - 1) + [(P, P)]
    avg_p = jnp.pad(avg, padP)
    mx_p = jnp.pad(mx, padP)

    col = lax.broadcasted_iota(jnp.int32, (1,) * (nd - 1) + (HWp,), nd - 1) % W
    not_left = col > 0                             # valid when dx == -1
    not_right = col < (W - 1)                      # valid when dx == +1

    acc = jnp.zeros(avg.shape[:-1] + (HWp,), dtype=jnp.float32)
    for ky in range(3):
        dy = ky - 1
        for kx in range(3):
            dx = kx - 1
            off = P + dy * W + dx                  # static slice start
            w_avg = w_ref[ky * 3 + kx]             # SMEM scalar reads
            w_max = w_ref[9 + ky * 3 + kx]
            contrib = (w_avg * avg_p[..., off:off + HWp]
                       + w_max * mx_p[..., off:off + HWp])
            if dx == -1:
                contrib = jnp.where(not_left, contrib, 0.0)
            elif dx == 1:
                contrib = jnp.where(not_right, contrib, 0.0)
            acc = acc + contrib
    return jax.nn.sigmoid(acc)


def _sa_kernel_single(w_ref, x_ref, o_ref, *, W, C, HW, HWp):
    """Single channel step: whole (Nb, C, HW) block reduced + conv in one shot."""
    x = x_ref[...].astype(jnp.float32)                       # (Nb, C, HW)
    s = jnp.sum(x, axis=1, keepdims=True)                    # (Nb, 1, HW)
    m = jnp.max(x, axis=1, keepdims=True)
    avg = s * jnp.float32(1.0 / C)
    y = _conv3x3_sigmoid(w_ref, avg, m, W=W, HW=HW, HWp=HWp) # (Nb, 1, HWp)
    o_ref[...] = y.astype(o_ref.dtype)


def _sa_kernel_streamed(w_ref, x_ref, o_ref, sum_sc, max_sc, *, W, C, ct, HW, HWp):
    """Streamed channel reduction (ct % 8 == 0), (8, HW) VPU accumulators in scratch."""
    c = pl.program_id(1)
    nc = pl.num_programs(1)

    @pl.when(c == 0)
    def _init():
        sum_sc[...] = jnp.zeros(sum_sc.shape, dtype=sum_sc.dtype)
        max_sc[...] = jnp.full(max_sc.shape, -jnp.inf, dtype=max_sc.dtype)

    x = x_ref[0].astype(jnp.float32)                         # (ct, HW)

    if C % ct != 0:
        # Mask invalid channel rows of the (possibly partial / OOB) last block.
        ch = lax.broadcasted_iota(jnp.int32, (ct, 1), 0) + c * ct
        valid = ch < C
        x_s = jnp.where(valid, x, 0.0)
        x_m = jnp.where(valid, x, -jnp.inf)
    else:
        x_s = x
        x_m = x

    g = ct // 8                                              # ct % 8 == 0 by construction
    xs = x_s.reshape(g, 8, HW)
    xm = x_m.reshape(g, 8, HW)
    sum_sc[...] = sum_sc[...] + jnp.sum(xs, axis=0)          # elementwise VPU adds
    max_sc[...] = jnp.maximum(max_sc[...], jnp.max(xm, axis=0))

    @pl.when(c == nc - 1)
    def _finalize():
        s = jnp.sum(sum_sc[...], axis=0, keepdims=True)      # single 8->1 XLU reduce
        m = jnp.max(max_sc[...], axis=0, keepdims=True)
        avg = s * jnp.float32(1.0 / C)
        y = _conv3x3_sigmoid(w_ref, avg, m, W=W, HW=HW, HWp=HWp)   # (1, HWp)
        o_ref[0] = y.astype(o_ref.dtype)


# ----------------------------------------------------------------------------- wrapper


def spatial_attention(x, weight, *, block_cap_bytes=None):
    """x: (N, C, H, W) float; weight: (1, 2, 3, 3). Returns (N, 1, H, W)."""
    assert jnp.issubdtype(x.dtype, jnp.floating), "float inputs only (max identity = -inf)"
    N, C, H, W = x.shape
    HW = H * W
    HWp = ((HW + 127) // 128) * 128                # lane-dense output width

    x_flat = x.reshape(N, C, HW)                   # contiguous merge — no HBM copy
    w_flat = weight.astype(jnp.float32).reshape(-1)  # (18,) scalar prefetch

    itemsize = x.dtype.itemsize
    vmem_cap = _vmem_capacity_bytes()
    if block_cap_bytes is None:
        block_cap_bytes = min(16 * 1024 * 1024, vmem_cap // 6)

    align = {4: 8, 2: 16, 1: 32}.get(itemsize, 8)
    ct = _pick_c_tile(C, HW * itemsize, block_cap_bytes, align)
    nc = -(-C // ct)

    if nc == 1:
        Nb = _pick_n_tile(N, C * HW * itemsize, block_cap_bytes)
    else:
        Nb = 1
    nb = N // Nb

    # VMEM budget: double-buffered input + output, scratch, in-kernel f32 working copy.
    in_block = Nb * ct * HW * itemsize
    out_block = Nb * HWp * itemsize
    scratch_b = (2 * 8 * HW * 4) if nc > 1 else 0
    need = 2 * in_block + 2 * out_block + scratch_b + Nb * ct * HW * 4
    vmem_limit = int(min(int(vmem_cap * 0.9), max(need + (4 << 20), 32 << 20)))

    if nc == 1:
        kernel = functools.partial(_sa_kernel_single, W=W, C=C, HW=HW, HWp=HWp)
        scratch_shapes = []
    else:
        kernel = functools.partial(_sa_kernel_streamed, W=W, C=C, ct=ct, HW=HW, HWp=HWp)
        scratch_shapes = [pltpu.VMEM((8, HW), jnp.float32),   # running channel sum
                          pltpu.VMEM((8, HW), jnp.float32)]   # running channel max

    cost = pl.CostEstimate(
        flops=int(3 * N * C * HW + 40 * N * HW),
        transcendentals=int(N * HW),
        bytes_accessed=int(N * C * HW * itemsize + N * HWp * itemsize + 72),
    )

    out_flat = pl.pallas_call(
        kernel,
        out_shape=jax.ShapeDtypeStruct((N, 1, HWp), x.dtype),
        grid_spec=pltpu.PrefetchScalarGridSpec(
            num_scalar_prefetch=1,
            grid=(nb, nc),
            in_specs=[
                pl.BlockSpec((Nb, ct, HW), lambda n, c, _w: (n, c, 0)),
            ],
            out_specs=pl.BlockSpec((Nb, 1, HWp), lambda n, c, _w: (n, 0, 0)),
            scratch_shapes=scratch_shapes,
        ),
        compiler_params=pltpu.CompilerParams(
            dimension_semantics=("parallel", "arbitrary"),
            vmem_limit_bytes=vmem_limit),
        cost_estimate=cost,
    )(w_flat, x_flat)

    return out_flat[:, :, :HW].reshape(N, 1, H, W)


# ----------------------------------------------------------------------------- reference


def _reference(x, weight):
    """Plain-JAX reference (sanity check). Note: computed in f32 like the kernel."""
    xf = x.astype(jnp.float32)
    avg = jnp.mean(xf, axis=1, keepdims=True)
    mx = jnp.max(xf, axis=1, keepdims=True)
    cat = jnp.concatenate([avg, mx], axis=1)               # (N, 2, H, W)
    y = lax.conv_general_dilated(
        cat, weight.astype(jnp.float32),
        window_strides=(1, 1), padding=((1, 1), (1, 1)),
        dimension_numbers=("NCHW", "OIHW", "NCHW"))
    return jax.nn.sigmoid(y).astype(x.dtype)


if __name__ == "__main__":
    key = jax.random.PRNGKey(0)
    kx, kw = jax.random.split(key)

    # Deterministic synthetic conv weight: Conv2d(2, 1, 3, bias=False) -> (1, 2, 3, 3)
    weight = jax.random.normal(kw, (1, 2, 3, 3), dtype=jnp.float32) * 0.1

    # 1) Main shape (single-pass path, ct == C, Nb == 1).
    N, C, H, W = 2, 4, 16, 16
    x = jax.random.normal(kx, (N, C, H, W), dtype=jnp.float32)
    out = jax.block_until_ready(spatial_attention(x, weight))
    assert out.shape == (N, 1, H, W)
    assert jnp.allclose(out, _reference(x, weight), atol=1e-5, rtol=1e-5)

    # 2) Streamed-reduction path with a masked partial channel block (forced tiny cap).
    x2 = jax.random.normal(jax.random.PRNGKey(1), (1, 20, 16, 16), dtype=jnp.float32)
    out2 = jax.block_until_ready(spatial_attention(x2, weight, block_cap_bytes=8 * 1024))
    assert jnp.allclose(out2, _reference(x2, weight), atol=1e-5, rtol=1e-5)

    # 3) Non-128-multiple HW (7x7 -> HWp=128) with batch folding (Nb > 1).
    x3 = jax.random.normal(jax.random.PRNGKey(2), (4, 8, 7, 7), dtype=jnp.float32)
    out3 = jax.block_until_ready(spatial_attention(x3, weight))
    assert jnp.allclose(out3, _reference(x3, weight), atol=1e-5, rtol=1e-5)

    print("KERNEL_OK")
</pallas_src>

<mosaic_0001>
module attributes {stable_mosaic.version = 11 : i64} {
  func.func @_sa_kernel_single(%arg0: i32, %arg1: i32, %arg2: memref<18xf32, #tpu.memory_space<smem>>, %arg3: memref<1x4x256xf32, #tpu.memory_space<vmem>>, %arg4: memref<1x1x256xf32, #tpu.memory_space<vmem>>) attributes {dimension_semantics = [#tpu.dimension_semantics<parallel>, #tpu.dimension_semantics<arbitrary>], iteration_bounds = array<i64: 2, 1>, scalar_prefetch = 1 : i64, scratch_operands = 0 : i64, tpu.core_type = #tpu.core_type<tc>, window_params = [{transform_indices = @transform_0, window_bounds = array<i64: 1, 4, 256>}, {transform_indices = @transform_1, window_bounds = array<i64: 1, 1, 256>}]} {
    %c0 = arith.constant 0 : index
    %c0_0 = arith.constant 0 : index
    %c0_1 = arith.constant 0 : index
    %0 = vector.load %arg3[%c0, %c0_0, %c0_1] : memref<1x4x256xf32, #tpu.memory_space<vmem>>, vector<1x4x256xf32>
    %cst = arith.constant dense<0.000000e+00> : vector<1x256xf32>
    %1 = vector.multi_reduction <add>, %0, %cst [1] : vector<1x4x256xf32> to vector<1x256xf32>
    %2 = vector.shape_cast %1 : vector<1x256xf32> to vector<1x1x256xf32>
    %cst_2 = arith.constant dense<0xFF800000> : vector<1x256xf32>
    %3 = vector.multi_reduction <maximumf>, %0, %cst_2 [1] : vector<1x4x256xf32> to vector<1x256xf32>
    %4 = vector.shape_cast %3 : vector<1x256xf32> to vector<1x1x256xf32>
    %cst_3 = arith.constant 2.500000e-01 : f32
    %5 = vector.broadcast %cst_3 : f32 to vector<1x1x256xf32>
    %6 = arith.mulf %2, %5 : vector<1x1x256xf32>
    %c0_i32 = arith.constant 0 : i32
    %7 = arith.sitofp %c0_i32 : i32 to f32
    %8 = vector.broadcast %7 : f32 to vector<1x1x17xf32>
    %9 = tpu.concatenate %8, %6 in 2 : vector<1x1x17xf32>, vector<1x1x256xf32> -> vector<1x1x273xf32>
    %10 = vector.broadcast %7 : f32 to vector<1x1x17xf32>
    %11 = tpu.concatenate %9, %10 in 2 : vector<1x1x273xf32>, vector<1x1x17xf32> -> vector<1x1x290xf32>
    %c0_i32_4 = arith.constant 0 : i32
    %12 = arith.sitofp %c0_i32_4 : i32 to f32
    %13 = vector.broadcast %12 : f32 to vector<1x1x17xf32>
    %14 = tpu.concatenate %13, %4 in 2 : vector<1x1x17xf32>, vector<1x1x256xf32> -> vector<1x1x273xf32>
    %15 = vector.broadcast %12 : f32 to vector<1x1x17xf32>
    %16 = tpu.concatenate %14, %15 in 2 : vector<1x1x273xf32>, vector<1x1x17xf32> -> vector<1x1x290xf32>
    %17 = tpu.iota {dimensions = array<i32: 2>} : vector<1x1x256xi32>
    %c16_i32 = arith.constant 16 : i32
    %c0_i32_5 = arith.constant 0 : i32
    %18 = arith.cmpi eq, %c16_i32, %c0_i32_5 : i32
    %c1_i32 = arith.constant 1 : i32
    %19 = arith.select %18, %c1_i32, %c16_i32 : i32
    %20 = vector.broadcast %19 : i32 to vector<1x1x256xi32>
    %21 = arith.remsi %17, %20 : vector<1x1x256xi32>
    %c0_i32_6 = arith.constant 0 : i32
    %22 = vector.broadcast %c0_i32_6 : i32 to vector<1x1x256xi32>
    %23 = arith.cmpi ne, %21, %22 : vector<1x1x256xi32>
    %c0_i32_7 = arith.constant 0 : i32
    %24 = vector.broadcast %c0_i32_7 : i32 to vector<1x1x256xi32>
    %25 = arith.cmpi slt, %21, %24 : vector<1x1x256xi32>
    %c0_i32_8 = arith.constant 0 : i32
    %26 = arith.cmpi slt, %19, %c0_i32_8 : i32
    %27 = vector.broadcast %26 : i1 to vector<1x1x256xi1>
    %28 = vector.broadcast %27 : vector<1x1x256xi1> to vector<1x1x256xi1>
    %29 = arith.xori %25, %28 : vector<1x1x256xi1>
    %30 = arith.andi %29, %23 : vector<1x1x256xi1>
    %31 = vector.broadcast %19 : i32 to vector<1x1x256xi32>
    %32 = arith.addi %21, %31 : vector<1x1x256xi32>
    %33 = arith.select %30, %32, %21 : vector<1x1x256xi1>, vector<1x1x256xi32>
    %c0_i32_9 = arith.constant 0 : i32
    %34 = vector.broadcast %c0_i32_9 : i32 to vector<1x1x256xi32>
    %35 = arith.cmpi sgt, %33, %34 : vector<1x1x256xi32>
    %c15_i32 = arith.constant 15 : i32
    %36 = vector.broadcast %c15_i32 : i32 to vector<1x1x256xi32>
    %37 = arith.cmpi slt, %33, %36 : vector<1x1x256xi32>
    %cst_10 = arith.constant 0.000000e+00 : f32
    %38 = vector.broadcast %cst_10 : f32 to vector<1x1x256xf32>
    %c0_11 = arith.constant 0 : index
    %39 = memref.load %arg2[%c0_11] : memref<18xf32, #tpu.memory_space<smem>>
    %c9 = arith.constant 9 : index
    %40 = memref.load %arg2[%c9] : memref<18xf32, #tpu.memory_space<smem>>
    %41 = vector.extract_strided_slice %11 {offsets = [0, 0, 0], sizes = [1, 1, 256], strides = [1, 1, 1]} : vector<1x1x290xf32> to vector<1x1x256xf32>
    %42 = vector.broadcast %39 : f32 to vector<1x1x256xf32>
    %43 = arith.mulf %42, %41 : vector<1x1x256xf32>
    %44 = vector.extract_strided_slice %16 {offsets = [0, 0, 0], sizes = [1, 1, 256], strides = [1, 1, 1]} : vector<1x1x290xf32> to vector<1x1x256xf32>
    %45 = vector.broadcast %40 : f32 to vector<1x1x256xf32>
    %46 = arith.mulf %45, %44 : vector<1x1x256xf32>
    %47 = arith.addf %43, %46 : vector<1x1x256xf32>
    %cst_12 = arith.constant 0.000000e+00 : f32
    %48 = vector.broadcast %cst_12 : f32 to vector<1x1x256xf32>
    %49 = arith.select %35, %47, %48 : vector<1x1x256xi1>, vector<1x1x256xf32>
    %50 = arith.addf %38, %49 : vector<1x1x256xf32>
    %c1 = arith.constant 1 : index
    %51 = memref.load %arg2[%c1] : memref<18xf32, #tpu.memory_space<smem>>
    %c10 = arith.constant 10 : index
    %52 = memref.load %arg2[%c10] : memref<18xf32, #tpu.memory_space<smem>>
    %53 = vector.extract_strided_slice %11 {offsets = [0, 0, 1], sizes = [1, 1, 256], strides = [1, 1, 1]} : vector<1x1x290xf32> to vector<1x1x256xf32>
    %54 = vector.broadcast %51 : f32 to vector<1x1x256xf32>
    %55 = arith.mulf %54, %53 : vector<1x1x256xf32>
    %56 = vector.extract_strided_slice %16 {offsets = [0, 0, 1], sizes = [1, 1, 256], strides = [1, 1, 1]} : vector<1x1x290xf32> to vector<1x1x256xf32>
    %57 = vector.broadcast %52 : f32 to vector<1x1x256xf32>
    %58 = arith.mulf %57, %56 : vector<1x1x256xf32>
    %59 = arith.addf %55, %58 : vector<1x1x256xf32>
    %60 = arith.addf %50, %59 : vector<1x1x256xf32>
    %c2 = arith.constant 2 : index
    %61 = memref.load %arg2[%c2] : memref<18xf32, #tpu.memory_space<smem>>
    %c11 = arith.constant 11 : index
    %62 = memref.load %arg2[%c11] : memref<18xf32, #tpu.memory_space<smem>>
    %63 = vector.extract_strided_slice %11 {offsets = [0, 0, 2], sizes = [1, 1, 256], strides = [1, 1, 1]} : vector<1x1x290xf32> to vector<1x1x256xf32>
    %64 = vector.broadcast %61 : f32 to vector<1x1x256xf32>
    %65 = arith.mulf %64, %63 : vector<1x1x256xf32>
    %66 = vector.extract_strided_slice %16 {offsets = [0, 0, 2], sizes = [1, 1, 256], strides = [1, 1, 1]} : vector<1x1x290xf32> to vector<1x1x256xf32>
    %67 = vector.broadcast %62 : f32 to vector<1x1x256xf32>
    %68 = arith.mulf %67, %66 : vector<1x1x256xf32>
    %69 = arith.addf %65, %68 : vector<1x1x256xf32>
    %cst_13 = arith.constant 0.000000e+00 : f32
    %70 = vector.broadcast %cst_13 : f32 to vector<1x1x256xf32>
    %71 = arith.select %37, %69, %70 : vector<1x1x256xi1>, vector<1x1x256xf32>
    %72 = arith.addf %60, %71 : vector<1x1x256xf32>
    %c3 = arith.constant 3 : index
    %73 = memref.load %arg2[%c3] : memref<18xf32, #tpu.memory_space<smem>>
    %c12 = arith.constant 12 : index
    %74 = memref.load %arg2[%c12] : memref<18xf32, #tpu.memory_space<smem>>
    %75 = vector.extract_strided_slice %11 {offsets = [0, 0, 16], sizes = [1, 1, 256], strides = [1, 1, 1]} : vector<1x1x290xf32> to vector<1x1x256xf32>
    %76 = vector.broadcast %73 : f32 to vector<1x1x256xf32>
    %77 = arith.mulf %76, %75 : vector<1x1x256xf32>
    %78 = vector.extract_strided_slice %16 {offsets = [0, 0, 16], sizes = [1, 1, 256], strides = [1, 1, 1]} : vector<1x1x290xf32> to vector<1x1x256xf32>
    %79 = vector.broadcast %74 : f32 to vector<1x1x256xf32>
    %80 = arith.mulf %79, %78 : vector<1x1x256xf32>
    %81 = arith.addf %77, %80 : vector<1x1x256xf32>
    %cst_14 = arith.constant 0.000000e+00 : f32
    %82 = vector.broadcast %cst_14 : f32 to vector<1x1x256xf32>
    %83 = arith.select %35, %81, %82 : vector<1x1x256xi1>, vector<1x1x256xf32>
    %84 = arith.addf %72, %83 : vector<1x1x256xf32>
    %c4 = arith.constant 4 : index
    %85 = memref.load %arg2[%c4] : memref<18xf32, #tpu.memory_space<smem>>
    %c13 = arith.constant 13 : index
    %86 = memref.load %arg2[%c13] : memref<18xf32, #tpu.memory_space<smem>>
    %87 = vector.extract_strided_slice %11 {offsets = [0, 0, 17], sizes = [1, 1, 256], strides = [1, 1, 1]} : vector<1x1x290xf32> to vector<1x1x256xf32>
    %88 = vector.broadcast %85 : f32 to vector<1x1x256xf32>
    %89 = arith.mulf %88, %87 : vector<1x1x256xf32>
    %90 = vector.extract_strided_slice %16 {offsets = [0, 0, 17], sizes = [1, 1, 256], strides = [1, 1, 1]} : vector<1x1x290xf32> to vector<1x1x256xf32>
    %91 = vector.broadcast %86 : f32 to vector<1x1x256xf32>
    %92 = arith.mulf %91, %90 : vector<1x1x256xf32>
    %93 = arith.addf %89, %92 : vector<1x1x256xf32>
    %94 = arith.addf %84, %93 : vector<1x1x256xf32>
    %c5 = arith.constant 5 : index
    %95 = memref.load %arg2[%c5] : memref<18xf32, #tpu.memory_space<smem>>
    %c14 = arith.constant 14 : index
    %96 = memref.load %arg2[%c14] : memref<18xf32, #tpu.memory_space<smem>>
    %97 = vector.extract_strided_slice %11 {offsets = [0, 0, 18], sizes = [1, 1, 256], strides = [1, 1, 1]} : vector<1x1x290xf32> to vector<1x1x256xf32>
    %98 = vector.broadcast %95 : f32 to vector<1x1x256xf32>
    %99 = arith.mulf %98, %97 : vector<1x1x256xf32>
    %100 = vector.extract_strided_slice %16 {offsets = [0, 0, 18], sizes = [1, 1, 256], strides = [1, 1, 1]} : vector<1x1x290xf32> to vector<1x1x256xf32>
    %101 = vector.broadcast %96 : f32 to vector<1x1x256xf32>
    %102 = arith.mulf %101, %100 : vector<1x1x256xf32>
    %103 = arith.addf %99, %102 : vector<1x1x256xf32>
    %cst_15 = arith.constant 0.000000e+00 : f32
    %104 = vector.broadcast %cst_15 : f32 to vector<1x1x256xf32>
    %105 = arith.select %37, %103, %104 : vector<1x1x256xi1>, vector<1x1x256xf32>
    %106 = arith.addf %94, %105 : vector<1x1x256xf32>
    %c6 = arith.constant 6 : index
    %107 = memref.load %arg2[%c6] : memref<18xf32, #tpu.memory_space<smem>>
    %c15 = arith.constant 15 : index
    %108 = memref.load %arg2[%c15] : memref<18xf32, #tpu.memory_space<smem>>
    %109 = vector.extract_strided_slice %11 {offsets = [0, 0, 32], sizes = [1, 1, 256], strides = [1, 1, 1]} : vector<1x1x290xf32> to vector<1x1x256xf32>
    %110 = vector.broadcast %107 : f32 to vector<1x1x256xf32>
    %111 = arith.mulf %110, %109 : vector<1x1x256xf32>
    %112 = vector.extract_strided_slice %16 {offsets = [0, 0, 32], sizes = [1, 1, 256], strides = [1, 1, 1]} : vector<1x1x290xf32> to vector<1x1x256xf32>
    %113 = vector.broadcast %108 : f32 to vector<1x1x256xf32>
    %114 = arith.mulf %113, %112 : vector<1x1x256xf32>
    %115 = arith.addf %111, %114 : vector<1x1x256xf32>
    %cst_16 = arith.constant 0.000000e+00 : f32
    %116 = vector.broadcast %cst_16 : f32 to vector<1x1x256xf32>
    %117 = arith.select %35, %115, %116 : vector<1x1x256xi1>, vector<1x1x256xf32>
    %118 = arith.addf %106, %117 : vector<1x1x256xf32>
    %c7 = arith.constant 7 : index
    %119 = memref.load %arg2[%c7] : memref<18xf32, #tpu.memory_space<smem>>
    %c16 = arith.constant 16 : index
    %120 = memref.load %arg2[%c16] : memref<18xf32, #tpu.memory_space<smem>>
    %121 = vector.extract_strided_slice %11 {offsets = [0, 0, 33], sizes = [1, 1, 256], strides = [1, 1, 1]} : vector<1x1x290xf32> to vector<1x1x256xf32>
    %122 = vector.broadcast %119 : f32 to vector<1x1x256xf32>
    %123 = arith.mulf %122, %121 : vector<1x1x256xf32>
    %124 = vector.extract_strided_slice %16 {offsets = [0, 0, 33], sizes = [1, 1, 256], strides = [1, 1, 1]} : vector<1x1x290xf32> to vector<1x1x256xf32>
    %125 = vector.broadcast %120 : f32 to vector<1x1x256xf32>
    %126 = arith.mulf %125, %124 : vector<1x1x256xf32>
    %127 = arith.addf %123, %126 : vector<1x1x256xf32>
    %128 = arith.addf %118, %127 : vector<1x1x256xf32>
    %c8 = arith.constant 8 : index
    %129 = memref.load %arg2[%c8] : memref<18xf32, #tpu.memory_space<smem>>
    %c17 = arith.constant 17 : index
    %130 = memref.load %arg2[%c17] : memref<18xf32, #tpu.memory_space<smem>>
    %131 = vector.extract_strided_slice %11 {offsets = [0, 0, 34], sizes = [1, 1, 256], strides = [1, 1, 1]} : vector<1x1x290xf32> to vector<1x1x256xf32>
    %132 = vector.broadcast %129 : f32 to vector<1x1x256xf32>
    %133 = arith.mulf %132, %131 : vector<1x1x256xf32>
    %134 = vector.extract_strided_slice %16 {offsets = [0, 0, 34], sizes = [1, 1, 256], strides = [1, 1, 1]} : vector<1x1x290xf32> to vector<1x1x256xf32>
    %135 = vector.broadcast %130 : f32 to vector<1x1x256xf32>
    %136 = arith.mulf %135, %134 : vector<1x1x256xf32>
    %137 = arith.addf %133, %136 : vector<1x1x256xf32>
    %cst_17 = arith.constant 0.000000e+00 : f32
    %138 = vector.broadcast %cst_17 : f32 to vector<1x1x256xf32>
    %139 = arith.select %37, %137, %138 : vector<1x1x256xi1>, vector<1x1x256xf32>
    %140 = arith.addf %128, %139 : vector<1x1x256xf32>
    %141 = arith.negf %140 : vector<1x1x256xf32>
    %142 = math.exp %141 : vector<1x1x256xf32>
    %cst_18 = arith.constant 1.000000e+00 : f32
    %143 = vector.broadcast %cst_18 : f32 to vector<1x1x256xf32>
    %144 = arith.addf %143, %142 : vector<1x1x256xf32>
    %145 = arith.divf %143, %144 : vector<1x1x256xf32>
    %c0_19 = arith.constant 0 : index
    %c0_20 = arith.constant 0 : index
    %c0_21 = arith.constant 0 : index
    %146 = vector.load %arg4[%c0_19, %c0_20, %c0_21] : memref<1x1x256xf32, #tpu.memory_space<vmem>>, vector<1x1x256xf32>
    tpu.vector_store %arg4[%c0_19, %c0_20, %c0_21], %145 {strides = array<i32>} : memref<1x1x256xf32, #tpu.memory_space<vmem>>, vector<1x1x256xf32>,
    return
  }
  func.func @transform_0(%arg0: i32, %arg1: i32, %arg2: memref<18xf32, #tpu.memory_space<smem>>) -> (i32, i32, i32) {
    %c0_i32 = arith.constant 0 : i32
    %c0_i32_0 = arith.constant 0 : i32
    return %arg0, %arg1, %c0_i32 : i32, i32, i32
  }
  func.func @transform_1(%arg0: i32, %arg1: i32, %arg2: memref<18xf32, #tpu.memory_space<smem>>) -> (i32, i32, i32) {
    %c0_i32 = arith.constant 0 : i32
    %c0_i32_0 = arith.constant 0 : i32
    %c0_i32_1 = arith.constant 0 : i32
    return %arg0, %c0_i32, %c0_i32_0 : i32, i32, i32
  }
}

</mosaic_0001>

<bundles_post_ra>
// kernel: tpu_custom_call.1
= control target key start
LH: loop header
LB: loop body
LE: loop exit
PB: predicated region body
PF: predicated region fallthrough
CT: control target
= control target key end

     0   :  { %s1324_s0 = inlined_call_operand.hbm [shape: f32[18], index: 0, kind: input, shape index: {}]   ;;  %s1325_s1 = inlined_call_operand.hbm [shape: f32[2,4,256], index: 1, kind: input, shape index: {}]   ;;  %s1326_s2 = inlined_call_operand.hbm [shape: f32[2,1,256], index: 2, kind: output, shape index: {}]  }
   0x1   :  { %s747_s11 = scalar_lea.hbm %s1324_s0, 16 }
   0x2   :  { %p748_p0 = scmp.ne.s32.totalorder %s1324_s0, %s747_s11  ;;  %p751_p1 = scmp.lt.u32.totalorder %s747_s11, %s1324_s0 }
   0x4   :  { %p753_p2 = pnand %p751_p1, %p748_p0 }
   0x6   :  { %756 = shalt.err (!%p753_p2)  }
   0x7   :  { %s873_s16 = smov [#allocation3]  }
   0x8   :  { %8 = dma.hbm_to_smem %s1324_s0, 16, %s873_s16, [#allocation2] }
   0x9   :  { %839 = dma.done.wait [#allocation2], 16 }
   0xa   :  { %840 = vsyncadd [#allocation2], 4294967280 }
   0xb   :  { %10 = sfence }
   0xc   :  { %11 = vsyncpa [#allocation5], 0 }
   0xd   :  { %13 = vsyncpa [#allocation5 + $0x1], 0 }
   0xe   :  { %14 = vsyncpa [#allocation6], 0 }
   0xf   :  { %16 = vsyncpa [#allocation6 + $0x1], 0  ;;  %s913_s19 = smov 0   ;;  %s915_s20 = smov 0  }
  0x10   :  { %s917_s21 = smov 0   ;;  %s919_s22 = smov 0  }
  0x11   :  { %s921_s23 = smov 0   ;;  %s923_s24 = smov 0  }
  0x12 LB: > { %s629_s0 = sadd.s32 4294967295, %s871_s24   ;;  %s630_s25 = sadd.s32 4294967294, %s871_s24   ;;  %s871_s24 = sphi %s923_s24, %s22_s24   ;;  %s867_s23 = sphi %s921_s23, %s1350_s23   ;;  %s863_s22 = sphi %s919_s22, %s1349_s22   ;;  %s859_s21 = sphi %s917_s21, %s1348_s21   ;;  %s855_s20 = sphi %s915_s20, %s1347_s20   ;;  %s851_s19 = sphi %s913_s19, %s1346_s19  }
  0x13   : > { %s34_s26 = sadd.s32 1, %s867_s23  ;;  %s43_s27 = sadd.s32 1, %s859_s21 }
  0x14   : > { %p36_p3 = scmp.ge.s32.totalorder %s34_s26, 2  ;;  %p50_p4 = scmp.ne.s32.totalorder %s859_s21, %s855_s20 }
  0x15   : > { %p51_p5 = scmp.eq.s32.totalorder %s871_s24, 0  ;;  %p56_p6 = scmp.ne.s32.totalorder %s855_s20, %s851_s19 }
  0x16   : > { %s1352_s26 = smov (%p36_p3, %s34_s26), 0  ;;  %p57_p8 = scmp.eq.s32.totalorder %s629_s0, 0 }
  0x17   : > { %p954_p7 = por %p51_p5, %p50_p4  ;;  %s38_s29 = ssub.s32 %s867_s23, %s1352_s26 }
  0x18   : > { %p80_p9 = scmp.eq.s32.totalorder %s629_s0, 1  ;;  %p41_p10 = scmp.eq.s32.totalorder %s38_s29, 0 }
  0x19   : > { %p960_p11 = por %p57_p8, %p56_p6  ;;  %p86_p13 = scmp.eq.s32.totalorder %s630_s25, 1 }
  0x1a   : > { %p964_p12 = por %p80_p9, %p50_p4  ;;  %p677_p2 = scmp.lt.s32.totalorder %s871_s24, 2 }
  0x1b   : > { %s969_s4 = scalar_select %p41_p10, %s859_s21, %s43_s27  }
  0x1c   : > { %s1330_s3 = scalar_select %p964_p12, 1, 0 }
  0x1d   : > { %p971_p0 = por %p86_p13, %p56_p6  ;;  %s106_s6 = sand.u32 1, %s859_s21  }
  0x1e   : > { %s633_s7 = sshll.u32 %s106_s6, 3  ;;  %s663_s8 = sshll.u32 %s867_s23, 7 }
  0x1f   : > { %s1331_s5 = scalar_select %p971_p0, 1, 0 }
  0x20   : > { %s982_s11 = scalar_lea.hbm %s1325_s1, %s663_s8  ;;  %s110_s12 = scalar_lea.vmem [#allocation4], %s633_s7 }
  0x21   : > { %s120_s13 = sshll.u32 %s110_s12, 4  ;;  %p988_p3 = pnand %p677_p2, %p954_p7  ;;  %s984_s13 = int_to_ptr.vmem [resolvable:$true] %s120_s13 }
  0x22   : > { %s107_s15 = scalar_lea.sflag [#allocation5], %s106_s6  ;;  %s757_s16 = scalar_lea.hbm %s982_s11, 128 }
  0x23   : > { %p758_p6 = scmp.ne.s32.totalorder %s982_s11, %s757_s16  ;;  %p759_p8 = pneg %p988_p3 }
  0x24   : > { %s762_s0 = scalar_lea.hbm %s1325_s1, 256  ;;  %p763_p7 = scmp.lt.u32.totalorder %s982_s11, %s1325_s1 }
  0x25   : > { %p760_p9 = pnand %p759_p8, %p758_p6  ;;  %p764_p13 = scmp.lt.u32.totalorder %s762_s0, %s757_s16 }
  0x26   : > { %p766_p1 = scmp.lt.u32.totalorder %s757_s16, %s982_s11 }
  0x27   : > { %p761_p10 = pneg %p760_p9  ;;  %p765_p2 = por %p764_p13, %p763_p7 }
  0x29   : > { %p767_p4 = por %p766_p1, %p765_p2 }
  0x2b   : > { %p768_p5 = pnand %p767_p4, %p761_p10 }
  0x2d   : > { %771 = shalt.err (!%p768_p5)
}
  0x2e   : > { %s772_s28 = scalar_lea.vmem %s984_s13, 128  ;;  %s874_s29 = smov [#allocation4]  }
  0x2f   : > { %p773_p6 = scmp.ne.s32.totalorder %s984_s13, %s772_s28  ;;  %s777_s6 = sshll.u32 %s874_s29, 4  ;;  %s778_s6 = int_to_ptr.vmem [resolvable:$false] %s777_s6 }
  0x30   : > { %s779_s7 = scalar_lea.vmem %s778_s6, 256  ;;  %p780_p12 = scmp.lt.s32.totalorder %s984_s13, %s778_s6 }
  0x31   : > { %p775_p9 = pnand %p773_p6, %p759_p8  ;;  %p781_p7 = scmp.lt.s32.totalorder %s779_s7, %s772_s28 }
  0x33   : > { %p776_p0 = pneg %p775_p9  ;;  %p782_p13 = por %p781_p7, %p780_p12 }
  0x35   : > { %p783_p1 = pnand %p782_p13, %p776_p0 }
  0x37   : > { %786 = shalt.err (!%p783_p1)
}
  0x38   : > { %672 = dma.hbm_to_vmem [thread:$0]  (!%p988_p3), %s982_s11, 128, %s984_s13, %s107_s15  }
  0x39   : > { %p1333_p4 = scmp.lt.s32.totalorder %s871_s24, 3  ;;  %p1334_p5 = scmp.ge.s32.totalorder %s871_s24, 1 }
  0x3b   : > { %p126_p8 = pnand %p1334_p5, %p1333_p4 }
  0x3c   : > { %s1024_s8 = sand.u32 (!%p126_p8), 1, %s855_s20  }
  0x3d   : > { %129 = sbr.rel (%p126_p8) target bundleno = 415 (0x19f), region = 24  ;;  %s637_s9 = sshll.u32 (!%p126_p8), %s1024_s8, 3 }
  0x3e   : > { %s132_s10 = scalar_lea.sflag (!%p126_p8), [#allocation5], %s1024_s8  ;;  %s135_s12 = scalar_lea.vmem (!%p126_p8), [#allocation4], %s637_s9 }
  0x44   : > { %842 = dma.done.wait (%p960_p11), %s132_s10, 128  }
  0x45   : > { %844 = vsyncadd (%p960_p11), %s132_s10, 4294967168  ;;  %vm158_vm0 = vcmask 1043456   ;;  %v154_v0 = vld [vmem:[%s135_s12] sm:$0xff]  ;;  %s875_s30 = smov 17   ;;  %s643_s11 = sld [smem:[#allocation3 + $0xb]]  ;;  %vm195_vm1 = vcmask 138240  }
  0x46   : > { %v173_v1 = vsel %vm158_vm0, %v154_v0, -inf  ;;  %v159_v2 = vsel %vm158_vm0, %v154_v0, 0.0  ;;  %v156_v3 = vcombine.high %v154_v0, %v154_v0  ;;  %s641_s13 = sld [smem:[#allocation3 + $0xa]]  ;;  %s640_s15 = sld [smem:[#allocation3 + $0x1]]  ;;  %vm310_vm2 = vcmask 1031168  }
  0x47   : > { %v174_v4 = vrot.slane %v173_v1, 4  ;;  %v160_v5 = vrot.slane %v159_v2, 4  ;;  %s642_s14 = sld [smem:[#allocation3 + $0x2]]  ;;  %s647_s16 = sld [smem:[#allocation3 + $0xd]]  ;;  %vm281_vm3 = vcmask 1039360   ;;  %vm341_vm6 = vcmask 916480  }
  0x48   : > { %v180_v6 = vsel %vm158_vm0, %v156_v3, -inf  ;;  %v166_v7 = vsel %vm158_vm0, %v156_v3, 0.0  ;;  %s645_s17 = sld [smem:[#allocation3 + $0xc]]  ;;  %s644_s0 = sld [smem:[#allocation3 + $0x3]]  ;;  %vm401_vm9 = vcmask 900096   ;;  %vm372_vm10 = vcmask 908288  }
  0x49   : > { %v175_v8 = vmax.f32 %v173_v1, %v174_v4  ;;  %v161_v9 = vadd.f32 %v160_v5, %v159_v2  ;;  %v181_v10 = vrot.slane %v180_v6, 4  ;;  %v167_v11 = vrot.slane %v166_v7, 4  ;;  %s646_s18 = sld [smem:[#allocation3 + $0x4]]  ;;  %s650_s25 = sld [smem:[#allocation3 + $0x6]] }
  0x4a   : > { %s651_s27 = sld [smem:[#allocation3 + $0xf]]  ;;  %s648_s28 = sld [smem:[#allocation3 + $0x5]]  ;;  %vm432_vm11 = vcmask 785408   ;;  %vm463_vm12 = vcmask 777216   ;;  %vm492_vm13 = vcmask 769024  }
  0x4b   : > { %v176_v12 = vrot.slane %v175_v8, 2  ;;  %v162_v13 = vrot.slane %v161_v9, 2  ;;  %v182_v14 = vmax.f32 %v180_v6, %v181_v10  ;;  %v168_v15 = vadd.f32 %v167_v11, %v166_v7  ;;  %s649_s29 = sld [smem:[#allocation3 + $0xe]]  ;;  %s655_s6 = sld [smem:[#allocation3 + $0x11]] }
  0x4c   : > { %v1032_v32 = vstv %s643_s11  ;;  %v1034_v33 = vstv %s641_s13  ;;  %v1041_v37 = vstv %s640_s15  ;;  %s1051_s7 = sld [smem:[#allocation3 + $0x8]]  ;;  %s652_s9 = sld [smem:[#allocation3 + $0x7]] }
  0x4d   : > { %v177_v16 = vmax.f32 %v175_v8, %v176_v12  ;;  %v163_v17 = vadd.f32 %v162_v13, %v161_v9  ;;  %v183_v18 = vrot.slane %v182_v14, 2  ;;  %v169_v19 = vrot.slane %v168_v15, 2  ;;  %s653_s10 = sld [smem:[#allocation3 + $0x10]]  ;;  %s876_s12 = smov 126  }
  0x4e   : > { %v1039_v36 = vstv %s642_s14  ;;  %v1047_v41 = vstv %s647_s16  ;;  %v1049_v42 = vstv %s645_s17  ;;  %v1058_v45 = vstv %s644_s0  ;;  %s1092_s11 = sld [smem:[#allocation3]]  ;;  %s1101_s13 = sld [smem:[#allocation3 + $0x9]] }
  0x4f   : > { %v178_v20 = vrot.slane %v177_v16, 1  ;;  %v164_v21 = vrot.slane %v163_v17, 1  ;;  %v184_v22 = vmax.f32 %v182_v14, %v183_v18  ;;  %v170_v23 = vadd.f32 %v169_v19, %v168_v15  ;;  %s878_s14 = smov 111   ;;  %s879_s15 = smov 112  }
  0x50   : > { %v1056_v44 = vstv %s646_s18  ;;  %v1068_v50 = vstv %s650_s25  ;;  %v1070_v51 = vstv %s651_s27  ;;  %v1076_v56 = vstv %s648_s28  ;;  %s880_s16 = smov 96   ;;  %s881_s17 = smov 110  }
  0x51   : > { %v179_v24 = vmax.f32 %v177_v16, %v178_v20  ;;  %v165_v25 = vadd.f32 %v164_v21, %v163_v17  ;;  %v185_v26 = vrot.slane %v184_v22, 1  ;;  %v171_v27 = vrot.slane %v170_v23, 1  ;;  %s882_s18 = smov 94   ;;  %s883_s0 = smov 95  }
  0x52   : > { %v1078_v57 = vstv %s649_s29  ;;  %v1086_v60 = vstv %s655_s6  ;;  %v1095_v2 = vstv %s1051_s7  ;;  %v1097_v3 = vstv %s652_s9  ;;  %s638_s25 = sshll.u32 %s1024_s8, 1  ;;  %s664_s27 = sshll.u32 %s863_s22, 5 }
  0x53   : > { %204 = vrot.lane.b32.xlu1 %v179_v24, %s875_s30  ;;  %v187_v28 = vmul.f32 0.25, %v165_v25  ;;  %v186_v29 = vmax.f32 %v184_v22, %v185_v26  ;;  %v172_v30 = vadd.f32 %v171_v27, %v170_v23  ;;  %v1099_v4 = vstv %s653_s10  ;;  %s153_s28 = scalar_lea.vmem [#allocation7], %s638_s25  ;;  %s1275_s9 = scalar_lea.hbm %s1326_s2, %s664_s27 }
  0x54   : > { %v247_v21 = vstv %s1092_s11  ;;  %v250_v23 = vstv %s1101_s13  ;;  %s551_s29 = sshll.u32 %s153_s28, 4  ;;  %s537_s10 = scalar_lea.sflag [#allocation6], %s1024_s8  ;;  %s1277_s29 = int_to_ptr.vmem [resolvable:$true] %s551_s29 }
  0x55   : > { %191 = vrot.lane.b32.xlu0 %v187_v28, %s875_s30  ;;  %v188_v31 = vmul.f32 0.25, %v172_v30  ;;  %p1343_p12 = scmp.ne.s32.totalorder %s1330_s3, 0  ;;  %s885_s22 = smov [#allocation7]  }
  0x57   : > { %206 = vrot.lane.b32.xlu1 %v186_v29, %s875_s30 }
  0x59   : > { %193 = vrot.lane.b32.xlu0 %v188_v31, %s875_s30  ;;  %s877_s30 = smov 127  }
  0xc5   : > { %v205_v34 = vpop.permute.xlu1 %204 }
  0xc6   : > { %v1037_v35 = vsel %vm195_vm1, 0.0, %v205_v34 }
  0xc7   : > { %v192_v38 = vpop.permute.xlu0 %191  ;;  %v295_v39 = vmul.f32 %v1032_v32, %v1037_v35  ;;  %v266_v40 = vmul.f32 %v1034_v33, %v1037_v35  ;;  %v357_v48 = vmul.f32 %v1047_v41, %v1037_v35  ;;  %v326_v49 = vmul.f32 %v1049_v42, %v1037_v35 }
  0xc8   : > { %v1054_v43 = vsel %vm195_vm1, 0.0, %v192_v38  ;;  %v417_v59 = vmul.f32 %v1070_v51, %v1037_v35  ;;  %v386_v1 = vmul.f32 %v1078_v57, %v1037_v35  ;;  %v477_v6 = vmul.f32 %v1086_v60, %v1037_v35 }
  0xc9   : > { %v291_v46 = vmul.f32 %v1039_v36, %v1054_v43  ;;  %v262_v47 = vmul.f32 %v1041_v37, %v1054_v43  ;;  %v353_v54 = vmul.f32 %v1056_v44, %v1054_v43  ;;  %v322_v55 = vmul.f32 %v1058_v45, %v1054_v43  ;;  %v207_v5 = vpop.permute.xlu1 %206 }
  0xca   : > { %v413_v58 = vmul.f32 %v1068_v50, %v1054_v43  ;;  %v382_v0 = vmul.f32 %v1076_v56, %v1054_v43  ;;  %v1108_v7 = vsel %vm195_vm1, %v207_v5, 0.0  ;;  %v473_v12 = vmul.f32 %v1095_v2, %v1054_v43 }
  0xcb   : > { %v298_v52 = vadd.f32 %v295_v39, %v291_v46  ;;  %v269_v53 = vadd.f32 %v266_v40, %v262_v47  ;;  %v194_v61 = vpop.permute.xlu0 %193  ;;  %v360_v62 = vadd.f32 %v357_v48, %v353_v54  ;;  %v329_v63 = vadd.f32 %v326_v49, %v322_v55 }
  0xcc   : > { %v1111_v8 = vsel %vm195_vm1, %v192_v38, %v194_v61  ;;  %v1114_v9 = vsel %vm195_vm1, %v194_v61, 0.0  ;;  %v420_v10 = vadd.f32 %v417_v59, %v413_v58  ;;  %v389_v11 = vadd.f32 %v386_v1, %v382_v0 }
  0xcd   : > { %304 = vrot.lane.b32.xlu1 %v298_v52, %s876_s12  ;;  %275 = vrot.lane.b32.xlu0 %v269_v53, %s877_s30  ;;  %v444_v13 = vmul.f32 %v1097_v3, %v1054_v43  ;;  %v448_v14 = vmul.f32 %v1099_v4, %v1037_v35  ;;  %v1123_v15 = vsel %vm195_vm1, %v205_v34, %v207_v5 }
  0xce   : > { %v264_v16 = vmul.f32 %v1041_v37, %v1114_v9  ;;  %v268_v17 = vmul.f32 %v1034_v33, %v1108_v7  ;;  %v263_v18 = vmul.f32 %v1041_v37, %v1111_v8  ;;  %v480_v19 = vadd.f32 %v477_v6, %v473_v12 }
  0xcf   : > { %v451_v20 = vadd.f32 %v448_v14, %v444_v13  ;;  %v267_v22 = vmul.f32 %v1034_v33, %v1123_v15  ;;  %v292_v26 = vmul.f32 %v1039_v36, %v1111_v8  ;;  %v293_v27 = vmul.f32 %v1039_v36, %v1114_v9 }
  0xd0   : > { %v271_v24 = vadd.f32 %v268_v17, %v264_v16  ;;  %v248_v28 = vmul.f32 %v247_v21, %v1054_v43  ;;  %v297_v29 = vmul.f32 %v1032_v32, %v1108_v7  ;;  %v251_v30 = vmul.f32 %v250_v23, %v1037_v35 }
  0xd1   : > { %366 = vrot.lane.b32.xlu1 %v360_v62, %s878_s14  ;;  %335 = vrot.lane.b32.xlu0 %v329_v63, %s879_s15  ;;  %v270_v25 = vadd.f32 %v267_v22, %v263_v18  ;;  %v249_v31 = vmul.f32 %v247_v21, %v1111_v8  ;;  %v252_v33 = vmul.f32 %v250_v23, %v1123_v15 }
  0xd2   : > { %v296_v34 = vmul.f32 %v1032_v32, %v1123_v15  ;;  %v1153_v37 = vadd.f32 %v251_v30, %v248_v28  ;;  %v300_v39 = vadd.f32 %v297_v29, %v293_v27  ;;  %v324_v35 = vmul.f32 %v1058_v45, %v1114_v9 }
  0xd3   : > { %v1155_v36 = vadd.f32 %v252_v33, %v249_v31  ;;  %v328_v40 = vmul.f32 %v1049_v42, %v1108_v7  ;;  %v323_v43 = vmul.f32 %v1058_v45, %v1111_v8  ;;  %v327_v32 = vmul.f32 %v1049_v42, %v1123_v15 }
  0xd4   : > { %v299_v38 = vadd.f32 %v296_v34, %v292_v26  ;;  %v354_v46 = vmul.f32 %v1056_v44, %v1111_v8  ;;  %v355_v49 = vmul.f32 %v1056_v44, %v1114_v9  ;;  %v359_v52 = vmul.f32 %v1047_v41, %v1108_v7 }
  0xd5   : > { %426 = vrot.lane.b32.xlu1 %v420_v10, %s880_s16  ;;  %395 = vrot.lane.b32.xlu0 %v389_v11, %s881_s17  ;;  %v331_v47 = vadd.f32 %v328_v40, %v324_v35  ;;  %v330_v48 = vadd.f32 %v327_v32, %v323_v43  ;;  %v358_v45 = vmul.f32 %v1047_v41, %v1123_v15 }
  0xd6   : > { %v384_v42 = vmul.f32 %v1076_v56, %v1114_v9  ;;  %v388_v53 = vmul.f32 %v1078_v57, %v1108_v7  ;;  %v362_v55 = vadd.f32 %v359_v52, %v355_v49  ;;  %v383_v44 = vmul.f32 %v1076_v56, %v1111_v8 }
  0xd7   : > { %v361_v54 = vadd.f32 %v358_v45, %v354_v46  ;;  %v387_v58 = vmul.f32 %v1078_v57, %v1123_v15  ;;  %v414_v61 = vmul.f32 %v1068_v50, %v1111_v8  ;;  %v415_v62 = vmul.f32 %v1068_v50, %v1114_v9 }
  0xd8   : > { %v391_v59 = vadd.f32 %v388_v53, %v384_v42  ;;  %v419_v63 = vmul.f32 %v1070_v51, %v1108_v7  ;;  %v418_v56 = vmul.f32 %v1070_v51, %v1123_v15  ;;  %v446_v57 = vmul.f32 %v1097_v3, %v1114_v9 }
  0xd9   : > { %486 = vrot.lane.b32.xlu1 %v480_v19, %s882_s18  ;;  %457 = vrot.lane.b32.xlu0 %v451_v20, %s883_s0  ;;  %v390_v41 = vadd.f32 %v387_v58, %v383_v44  ;;  %v450_v5 = vmul.f32 %v1099_v4, %v1108_v7  ;;  %v445_v50 = vmul.f32 %v1097_v3, %v1111_v8 }
  0xda   : > { %v421_v0 = vadd.f32 %v418_v56, %v414_v61  ;;  %v422_v1 = vadd.f32 %v419_v63, %v415_v62  ;;  %v449_v6 = vmul.f32 %v1099_v4, %v1123_v15  ;;  %v474_v51 = vmul.f32 %v1095_v2, %v1111_v8 }
  0xdb   : > { %v453_v10 = vadd.f32 %v450_v5, %v446_v57  ;;  %v475_v12 = vmul.f32 %v1095_v2, %v1114_v9  ;;  %v479_v13 = vmul.f32 %v1086_v60, %v1108_v7  ;;  %v478_v3 = vmul.f32 %v1086_v60, %v1123_v15 }
  0xdc   : > { %v452_v11 = vadd.f32 %v449_v6, %v445_v50  ;;  %v214_v7 = vlaneseq }
  0xdd   : > { %279 = vrot.lane.b32.xlu0 %v271_v24, %s877_s30  ;;  %277 = vrot.lane.b32.xlu1 %v270_v25, %s877_s30  ;;  %v481_v14 = vadd.f32 %v478_v3, %v474_v51  ;;  %v482_v4 = vadd.f32 %v479_v13, %v475_v12  ;;  %s791_s30 = sshll.u32 %s885_s22, 4  ;;  %s792_s30 = int_to_ptr.vmem [resolvable:$false] %s791_s30 }
  0xde   : > { %v215_v21 = vand.u32 127, %v214_v7  ;;  %v520_v33 = vshrl.u32 %v214_v7, 7  ;;  %vm533_vm14 = vcmp.lt.s32.totalorder %v214_v7, 256  ;;  %s793_s11 = scalar_lea.vmem %s792_s30, 64  ;;  %p794_p10 = scmp.lt.s32.totalorder %s1277_s29, %s792_s30 }
  0xe0   : > { %v216_v15 = vadd.s32 128, %v215_v21  ;;  %v221_v23 = vand.u32 15, %v215_v21 }
  0xe1   : > { %306 = vrot.lane.b32.xlu0 %v299_v38, %s876_s12  ;;  %308 = vrot.lane.b32.xlu1 %v300_v39, %s876_s12  ;;  %s787_s12 = scalar_lea.vmem %s1277_s29, 32 }
  0xe2   : > { %v228_v24 = vand.u32 15, %v216_v15  ;;  %vm1224_vm4 = vcmp.gt.s32.totalorder %v221_v23, 0  ;;  %vm1232_vm7 = vcmp.lt.s32.totalorder %v221_v23, 15  ;;  %p788_p11 = scmp.ne.s32.totalorder %s1277_s29, %s787_s12  ;;  %p795_p2 = scmp.lt.s32.totalorder %s793_s11, %s787_s12 }
  0xe3   : > { %v255_v32 = vsel %vm1224_vm4, %v1153_v37, 0.0 }
  0xe4   : > { %vm1228_vm5 = vcmp.gt.s32.totalorder %v228_v24, 0  ;;  %vm1236_vm8 = vcmp.lt.s32.totalorder %v228_v24, 15  ;;  %p789_p0 = pnand %p788_p11, %p1343_p12  ;;  %p796_p6 = por %p795_p2, %p794_p10 }
  0xe5   : > { %339 = vrot.lane.b32.xlu0 %v331_v47, %s879_s15  ;;  %337 = vrot.lane.b32.xlu1 %v330_v48, %s879_s15  ;;  %v256_v46 = vsel %vm1228_vm5, %v1155_v36, 0.0 }
  0xe6   : > { %p790_p3 = pneg %p789_p0 }
  0xe8   : > { %p797_p9 = pnand %p796_p6, %p790_p3 }
  0xe9   : > { %368 = vrot.lane.b32.xlu0 %v361_v54, %s878_s14  ;;  %370 = vrot.lane.b32.xlu1 %v362_v55, %s878_s14 }
  0xed   : > { %399 = vrot.lane.b32.xlu0 %v391_v59, %s881_s17  ;;  %397 = vrot.lane.b32.xlu1 %v390_v41, %s881_s17 }
  0xf1   : > { %428 = vrot.lane.b32.xlu0 %v421_v0, %s880_s16  ;;  %430 = vrot.lane.b32.xlu1 %v422_v1, %s880_s16 }
  0xf5   : > { %461 = vrot.lane.b32.xlu0 %v453_v10, %s883_s0  ;;  %459 = vrot.lane.b32.xlu1 %v452_v11, %s883_s0 }
  0xf9   : > { %488 = vrot.lane.b32.xlu0 %v481_v14, %s882_s18  ;;  %490 = vrot.lane.b32.xlu1 %v482_v4, %s882_s18 }
 0x13f   : > { %v305_v8 = vpop.permute.xlu1 %304  ;;  %v276_v16 = vpop.permute.xlu0 %275 }
 0x143   : > { %v367_v17 = vpop.permute.xlu1 %366  ;;  %v336_v2 = vpop.permute.xlu0 %335 }
 0x147   : > { %v427_v9 = vpop.permute.xlu1 %426  ;;  %v396_v18 = vpop.permute.xlu0 %395 }
 0x14b   : > { %v1219_v19 = vpop.permute.xlu1 %486  ;;  %v1221_v20 = vpop.permute.xlu0 %457 }
 0x14f   : > { %v278_v60 = vpop.permute.xlu1 %277  ;;  %v280_v22 = vpop.permute.xlu0 %279 }
 0x150   : > { %v282_v39 = vsel %vm281_vm3, %v276_v16, %v278_v60  ;;  %v283_v35 = vsel %vm281_vm3, %v278_v60, %v280_v22 }
 0x151   : > { %v286_v45 = vadd.f32 %v282_v39, %v255_v32  ;;  %v287_v42 = vadd.f32 %v283_v35, %v256_v46 }
 0x153   : > { %v309_v25 = vpop.permute.xlu1 %308  ;;  %v307_v26 = vpop.permute.xlu0 %306 }
 0x154   : > { %v311_v34 = vsel %vm310_vm2, %v305_v8, %v307_v26  ;;  %v312_v38 = vsel %vm310_vm2, %v307_v26, %v309_v25 }
 0x155   : > { %v315_v47 = vsel %vm1232_vm7, %v311_v34, 0.0  ;;  %v316_v48 = vsel %vm1236_vm8, %v312_v38, 0.0 }
 0x156   : > { %v317_v54 = vadd.f32 %v315_v47, %v286_v45  ;;  %v318_v55 = vadd.f32 %v316_v48, %v287_v42 }
 0x157   : > { %v338_v29 = vpop.permute.xlu1 %337  ;;  %v340_v30 = vpop.permute.xlu0 %339 }
 0x158   : > { %v342_v40 = vsel %vm341_vm6, %v336_v2, %v338_v29  ;;  %v343_v43 = vsel %vm341_vm6, %v338_v29, %v340_v30 }
 0x159   : > { %v346_v53 = vsel %vm1224_vm4, %v342_v40, 0.0  ;;  %v347_v37 = vsel %vm1228_vm5, %v343_v43, 0.0 }
 0x15a   : > { %v348_v58 = vadd.f32 %v346_v53, %v317_v54  ;;  %v349_v59 = vadd.f32 %v347_v37, %v318_v55 }
 0x15b   : > { %v371_v49 = vpop.permute.xlu1 %370  ;;  %v369_v52 = vpop.permute.xlu0 %368 }
 0x15c   : > { %v373_v62 = vsel %vm372_vm10, %v367_v17, %v369_v52  ;;  %v374_v63 = vsel %vm372_vm10, %v369_v52, %v371_v49 }
 0x15d   : > { %v377_v5 = vadd.f32 %v373_v62, %v348_v58  ;;  %v378_v50 = vadd.f32 %v374_v63, %v349_v59 }
 0x15f   : > { %v398_v36 = vpop.permute.xlu1 %397  ;;  %v400_v44 = vpop.permute.xlu0 %399 }
 0x160   : > { %v402_v41 = vsel %vm401_vm9, %v396_v18, %v398_v36  ;;  %v403_v61 = vsel %vm401_vm9, %v398_v36, %v400_v44 }
 0x161   : > { %v406_v56 = vsel %vm1232_vm7, %v402_v41, 0.0  ;;  %v407_v57 = vsel %vm1236_vm8, %v403_v61, 0.0 }
 0x162   : > { %v408_v12 = vadd.f32 %v406_v56, %v377_v5  ;;  %v409_v13 = vadd.f32 %v407_v57, %v378_v50 }
 0x163   : > { %v431_v0 = vpop.permute.xlu1 %430  ;;  %v429_v1 = vpop.permute.xlu0 %428 }
 0x164   : > { %v433_v6 = vsel %vm432_vm11, %v427_v9, %v429_v1  ;;  %v434_v51 = vsel %vm432_vm11, %v429_v1, %v431_v0 }
 0x165   : > { %v437_v10 = vsel %vm1224_vm4, %v433_v6, 0.0  ;;  %v438_v11 = vsel %vm1228_vm5, %v434_v51, 0.0 }
 0x166   : > { %v439_v4 = vadd.f32 %v437_v10, %v408_v12  ;;  %v440_v8 = vadd.f32 %v438_v11, %v409_v13 }
 0x167   : > { %v460_v3 = vpop.permute.xlu1 %459  ;;  %v462_v14 = vpop.permute.xlu0 %461 }
 0x168   : > { %v464_v16 = vsel %vm463_vm12, %v1221_v20, %v460_v3  ;;  %v465_v17 = vsel %vm463_vm12, %v460_v3, %v462_v14 }
 0x169   : > { %v468_v18 = vadd.f32 %v464_v16, %v439_v4  ;;  %v469_v21 = vadd.f32 %v465_v17, %v440_v8 }
 0x16b   : > { %v491_v2 = vpop.permute.xlu1 %490  ;;  %v489_v9 = vpop.permute.xlu0 %488 }
 0x16c   : > { %v493_v60 = vsel %vm492_vm13, %v1219_v19, %v489_v9  ;;  %v494_v15 = vsel %vm492_vm13, %v489_v9, %v491_v2  ;;  %v884_v19 = vmov 1966171168  }
 0x16d   : > { %v497_v22 = vsel %vm1232_vm7, %v493_v60, 0.0  ;;  %v498_v23 = vsel %vm1236_vm8, %v494_v15, 0.0  ;;  %v517_v31 = vunpack.c.l.s4 %v884_v19 }
 0x16e   : > { %v499_v24 = vadd.f32 %v497_v22, %v468_v18  ;;  %v500_v25 = vadd.f32 %v498_v23, %v469_v21 }
 0x16f   : > { %v518_v34 = vunpack.c.0.s8 %v517_v31 }
 0x170   : > { %v656_v26 = vmul.f32 -1.442695, %v499_v24  ;;  %v657_v20 = vmul.f32 -1.442695, %v500_v25 }
 0x171   : > { %v521_v39 = vsub.s32 %v518_v34, %v520_v33 }
 0x172   : > { %739 = vpow2.f32 %v656_v26 }
 0x173   : > { %741 = vpow2.f32 %v657_v20 }
 0x17c   : > { %v740_v27 = vpop.eup %739 }
 0x17d   : > { %v742_v28 = vpop.eup %741  ;;  %v507_v29 = vadd.f32 1.0, %v740_v27 }
 0x17e   : > { %v508_v30 = vadd.f32 1.0, %v742_v28 }
 0x17f   : > { %743 = vrcp.f32 %v507_v29 }
 0x180   : > { %745 = vrcp.f32 %v508_v30 }
 0x189   : > { %v744_v38 = vpop.eup %743 }
 0x18a   : > { %v746_v35 = vpop.eup %745 }
 0x18b   : > { %v515_v40 = vcombine.low %v744_v38, %v746_v35 }
 0x18d   : > { %v522_v43 = vrot.slane %v515_v40, %v521_v39 }
 0x18f   : > { %v529_v32 = vrot.slane %v522_v43, %v521_v39 }
 0x191   : > { %535 = vst.msk [vmem:[%s153_s28] sm:$0x3] %vm533_vm14, %v529_v32 }
 0x192   : > { %800 = shalt.err (!%p797_p9)
}
 0x193   : > { %s801_s8 = scalar_lea.hbm %s1275_s9, 32  ;;  %s805_s15 = scalar_lea.hbm %s1326_s2, 64 }
 0x194   : > { %p802_p7 = scmp.ne.s32.totalorder %s1275_s9, %s801_s8  ;;  %p806_p4 = scmp.lt.u32.totalorder %s1275_s9, %s1326_s2 }
 0x195   : > { %p807_p5 = scmp.lt.u32.totalorder %s805_s15, %s801_s8  ;;  %p809_p11 = scmp.lt.u32.totalorder %s801_s8, %s1275_s9 }
 0x196   : > { %p803_p13 = pnand %p802_p7, %p1343_p12 }
 0x197   : > { %p808_p8 = por %p807_p5, %p806_p4 }
 0x198   : > { %p804_p1 = pneg %p803_p13 }
 0x199   : > { %p810_p0 = por %p809_p11, %p808_p8 }
 0x19b   : > { %p811_p3 = pnand %p810_p0, %p804_p1 }
 0x19d   : > { %814 = shalt.err (!%p811_p3)
}
 0x19e   : > { %667 = dma.vmem_to_hbm [thread:$0]  (%p1343_p12), %s1277_s29, 32, %s1275_s9, %s537_s10  }
 0x19f PF: > { %s563_s18 = sand.u32 1, %s851_s19   ;;  %p1344_p10 = scmp.ne.s32.totalorder %s1331_s5, 0 }
 0x1a0   : > { %p1345_p2 = scmp.ge.s32.totalorder %s871_s24, 2  ;;  %s564_s0 = scalar_lea.sflag [#allocation6], %s563_s18 }
 0x1a2   : > { %p674_p6 = pnand %p1345_p2, %p1344_p10 }
 0x1a4   : > { %846 = dma.done.wait (!%p674_p6), %s564_s0, 32  }
 0x1a5   : > { %848 = vsyncadd (!%p674_p6), %s564_s0, 4294967264  ;;  %s22_s24 = sadd.s32 1, %s871_s24   ;;  %s1346_s19 = smov %s855_s20 }
 0x1a6   : > { %p19_p9 = scmp.ge.s32.totalorder %s22_s24, 4   ;;  %s1347_s20 = smov %s859_s21 }
 0x1a7   : > { %s1348_s21 = smov %s969_s4  ;;  %s1349_s22 = smov %s867_s23 }
 0x1a8   : > { %s1350_s23 = smov %s1352_s26  ;;  %21 = sbr.rel (!%p19_p9) target bundleno = 18 (0x12), region = 69 }
 0x1af   :  { %569 = vsyncpa [#allocation5], 1 }
 0x1b0   :  { %571 = vsyncpa [#allocation5 + $0x1], 1 }
 0x1b1   :  { %572 = vsyncpa [#allocation6], 1 }
 0x1b2   :  { %574 = vsyncpa [#allocation6 + $0x1], 1 }

</bundles_post_ra>
